<compile_context>
chip_gen: v6e
topology: v6e:2x2x1
jax: 0.10.0
libtpu: 0.0.40
codegen_flags: <defaults>
</compile_context>

<pallas_src>
import functools

import jax
import jax.numpy as jnp
from jax.experimental import pallas as pl
from jax.experimental.pallas import tpu as pltpu

T_B = 0.7611
_LUM_W = (0.2627, 0.678, 0.0593)

# Per-channel lane elements per spatial tile (multiple of 128).
_TARGET_TILE_ELEMS = 64 * 1024


def _bright_intensity_lum_kernel(x_ref, o_ref, *, inv_t_b):
    # x_ref, o_ref: (bB, 3, tile_hw) blocks in VMEM; lane dim = tile_hw.
    x = x_ref[...]
    lum = (_LUM_W[0] * x[:, 0, :]
           + _LUM_W[1] * x[:, 1, :]
           + _LUM_W[2] * x[:, 2, :])
    val = jnp.clip(lum * inv_t_b, 0.0, 1.0).astype(o_ref.dtype)
    # Single full-block store of the 3 identical output channels.
    o_ref[...] = jnp.broadcast_to(val[:, None, :], o_ref.shape)


def bright_intensity_lum(x, t_b=T_B):
    """x: (B, 3, H, W) float array -> (B, 3, H, W)."""
    B, C, H, W = x.shape
    assert C == 3, "BrightIntensityLum expects 3 input channels (RGB)"
    HW = H * W

    # Lane-dense flatten (free reshape, contiguous memory).
    x2 = x.reshape(B, 3, HW)

    # Spatial tile: capped multiple-of-128 tile for large images; full extent
    # (allowed for any size via the full-dim exception) for small ones.
    if HW >= _TARGET_TILE_ELEMS:
        tile_hw = _TARGET_TILE_ELEMS  # multiple of 128; last block may be partial
    else:
        tile_hw = HW  # full-extent block along the lane dim

    # Fold batch elements per step for small images to amortize per-step cost.
    bB = max(1, min(B, _TARGET_TILE_ELEMS // max(tile_hw, 1)))

    grid = (pl.cdiv(B, bB), pl.cdiv(HW, tile_hw))

    out = pl.pallas_call(
        functools.partial(_bright_intensity_lum_kernel, inv_t_b=1.0 / t_b),
        out_shape=jax.ShapeDtypeStruct((B, 3, HW), x.dtype),
        grid_spec=pltpu.PrefetchScalarGridSpec(
            num_scalar_prefetch=0,
            grid=grid,
            in_specs=[pl.BlockSpec((bB, 3, tile_hw), lambda i, j: (i, 0, j))],
            out_specs=pl.BlockSpec((bB, 3, tile_hw), lambda i, j: (i, 0, j)),
        ),
        compiler_params=pltpu.CompilerParams(
            dimension_semantics=("parallel", "parallel"),
        ),
    )(x2)

    return out.reshape(B, 3, H, W)


def _reference(x, t_b=T_B):
    lum = (_LUM_W[0] * x[:, 0, :, :]
           + _LUM_W[1] * x[:, 1, :, :]
           + _LUM_W[2] * x[:, 2, :, :])
    lum = jnp.clip(lum / t_b, 0.0, 1.0)
    return jnp.repeat(lum[:, None, :, :], 3, axis=1)


if __name__ == "__main__":
    key = jax.random.PRNGKey(0)
    x = jax.random.uniform(key, (2, 3, 16, 16), dtype=jnp.float32)

    out = bright_intensity_lum(x)
    out = jax.block_until_ready(out)

    ref = _reference(x)
    assert out.shape == (2, 3, 16, 16)
    assert jnp.allclose(out, ref, atol=1e-6, rtol=1e-5)
    print("KERNEL_OK")
</pallas_src>

<mosaic_0001>
module attributes {stable_mosaic.version = 11 : i64} {
  func.func @_bright_intensity_lum_kernel(%arg0: i32, %arg1: i32, %arg2: memref<2x3x256xf32, #tpu.memory_space<vmem>>, %arg3: memref<2x3x256xf32, #tpu.memory_space<vmem>>) attributes {dimension_semantics = [#tpu.dimension_semantics<parallel>, #tpu.dimension_semantics<parallel>], iteration_bounds = array<i64: 1, 1>, scalar_prefetch = 0 : i64, scratch_operands = 0 : i64, tpu.core_type = #tpu.core_type<tc>, window_params = [{transform_indices = @transform_0, window_bounds = array<i64: 2, 3, 256>}, {transform_indices = @transform_1, window_bounds = array<i64: 2, 3, 256>}]} {
    %c0 = arith.constant 0 : index
    %c0_0 = arith.constant 0 : index
    %c0_1 = arith.constant 0 : index
    %0 = vector.load %arg2[%c0, %c0_0, %c0_1] : memref<2x3x256xf32, #tpu.memory_space<vmem>>, vector<2x3x256xf32>
    %1 = vector.extract_strided_slice %0 {offsets = [0, 0, 0], sizes = [2, 1, 256], strides = [1, 1, 1]} : vector<2x3x256xf32> to vector<2x1x256xf32>
    %2 = vector.shape_cast %1 : vector<2x1x256xf32> to vector<2x256xf32>
    %cst = arith.constant 2.627000e-01 : f32
    %3 = vector.broadcast %cst : f32 to vector<2x256xf32>
    %4 = arith.mulf %3, %2 : vector<2x256xf32>
    %5 = vector.extract_strided_slice %0 {offsets = [0, 1, 0], sizes = [2, 1, 256], strides = [1, 1, 1]} : vector<2x3x256xf32> to vector<2x1x256xf32>
    %6 = vector.shape_cast %5 : vector<2x1x256xf32> to vector<2x256xf32>
    %cst_2 = arith.constant 0.677999973 : f32
    %7 = vector.broadcast %cst_2 : f32 to vector<2x256xf32>
    %8 = arith.mulf %7, %6 : vector<2x256xf32>
    %9 = arith.addf %4, %8 : vector<2x256xf32>
    %10 = vector.extract_strided_slice %0 {offsets = [0, 2, 0], sizes = [2, 1, 256], strides = [1, 1, 1]} : vector<2x3x256xf32> to vector<2x1x256xf32>
    %11 = vector.shape_cast %10 : vector<2x1x256xf32> to vector<2x256xf32>
    %cst_3 = arith.constant 5.930000e-02 : f32
    %12 = vector.broadcast %cst_3 : f32 to vector<2x256xf32>
    %13 = arith.mulf %12, %11 : vector<2x256xf32>
    %14 = arith.addf %9, %13 : vector<2x256xf32>
    %cst_4 = arith.constant 1.31388783 : f32
    %15 = vector.broadcast %cst_4 : f32 to vector<2x256xf32>
    %16 = arith.mulf %14, %15 : vector<2x256xf32>
    %cst_5 = arith.constant 0.000000e+00 : f32
    %cst_6 = arith.constant 1.000000e+00 : f32
    %17 = vector.broadcast %cst_5 : f32 to vector<2x256xf32>
    %18 = arith.maximumf %17, %16 : vector<2x256xf32>
    %19 = vector.broadcast %cst_6 : f32 to vector<2x256xf32>
    %20 = arith.minimumf %19, %18 : vector<2x256xf32>
    %21 = vector.shape_cast %20 : vector<2x256xf32> to vector<2x1x256xf32>
    %22 = vector.shape_cast %21 : vector<2x1x256xf32> to vector<2x1x256xf32>
    %23 = vector.broadcast %22 : vector<2x1x256xf32> to vector<2x3x256xf32>
    %c0_7 = arith.constant 0 : index
    %c0_8 = arith.constant 0 : index
    %c0_9 = arith.constant 0 : index
    %24 = vector.load %arg3[%c0_7, %c0_8, %c0_9] : memref<2x3x256xf32, #tpu.memory_space<vmem>>, vector<2x3x256xf32>
    tpu.vector_store %arg3[%c0_7, %c0_8, %c0_9], %23 {strides = array<i32>} : memref<2x3x256xf32, #tpu.memory_space<vmem>>, vector<2x3x256xf32>,
    return
  }
  func.func @transform_0(%arg0: i32, %arg1: i32) -> (i32, i32, i32) {
    %c0_i32 = arith.constant 0 : i32
    %c0_i32_0 = arith.constant 0 : i32
    return %arg0, %c0_i32, %arg1 : i32, i32, i32
  }
  func.func @transform_1(%arg0: i32, %arg1: i32) -> (i32, i32, i32) {
    %c0_i32 = arith.constant 0 : i32
    %c0_i32_0 = arith.constant 0 : i32
    return %arg0, %c0_i32, %arg1 : i32, i32, i32
  }
}

</mosaic_0001>

<bundles_post_ra>
// kernel: tpu_custom_call.1
= control target key start
LH: loop header
LB: loop body
LE: loop exit
PB: predicated region body
PF: predicated region fallthrough
CT: control target
= control target key end

     0   :  { %v44_v9 = vlaneseq  ;;  %s120_s0 = inlined_call_operand.vmem [shape: f32[2,3,256], index: 0, kind: input, shape index: {}]   ;;  %s121_s1 = inlined_call_operand.vmem [shape: f32[2,3,256], index: 1, kind: output, shape index: {}]  }
   0x1   :  { %v8_v0 = vld [vmem:[%s120_s0] sm:$0x77]  ;;  %v9_v1 = vld [vmem:[%s120_s0 + $0x8] sm:$0x77] }
   0x2   :  { %v10_v2 = vmul.f32 0.2627, %v8_v0  ;;  %v12_v3 = vmul.f32 0.678, %v8_v0  ;;  %v24_v4 = vmul.f32 0.0593, %v8_v0 }
   0x3   :  { %v11_v5 = vmul.f32 0.2627, %v9_v1  ;;  %v13_v6 = vmul.f32 0.678, %v9_v1  ;;  %v25_v10 = vmul.f32 0.0593, %v9_v1 }
   0x4   :  { %v94_v7 = vrot.slane %v12_v3, 9  ;;  %v96_v8 = vrot.slane %v24_v4, 10  ;;  %v45_v16 = vshrl.u32 %v44_v9, 7 }
   0x5   :  { %v95_v11 = vrot.slane %v13_v6, 9  ;;  %v97_v13 = vrot.slane %v25_v10, 10 }
   0x6   :  { %v22_v12 = vadd.f32 %v94_v7, %v10_v2  ;;  %v46_v21 = vsub.s32 0, %v45_v16  ;;  %v50_v22 = vsub.s32 4, %v45_v16 }
   0x7   :  { %v23_v14 = vadd.f32 %v95_v11, %v11_v5 }
   0x8   :  { %v34_v15 = vadd.f32 %v96_v8, %v22_v12 }
   0x9   :  { %v35_v17 = vadd.f32 %v97_v13, %v23_v14 }
   0xa   :  { %v36_v18 = vmul.f32 1.3138878, %v34_v15 }
   0xb   :  { %v37_v19 = vmul.f32 1.3138878, %v35_v17 }
   0xc   :  { %v38_v20 = vmax.f32 %v36_v18, 0.0 }
   0xd   :  { %v39_v23 = vmax.f32 %v37_v19, 0.0 }
   0xe   :  { %v40_v24 = vmin.f32 %v38_v20, 1.0 }
   0xf   :  { %v41_v25 = vmin.f32 %v39_v23, 1.0 }
  0x10   :  { %v47_v26 = vrot.slane %v40_v24, %v46_v21  ;;  %v51_v27 = vrot.slane %v40_v24, %v50_v22 }
  0x11   :  { %v55_v28 = vrot.slane %v41_v25, %v46_v21  ;;  %v59_v29 = vrot.slane %v41_v25, %v50_v22 }
  0x12   :  { %v67_v30 = vrot.slane %v47_v26, %v46_v21  ;;  %v71_v31 = vrot.slane %v51_v27, %v46_v21 }
  0x13   :  { %v75_v32 = vrot.slane %v55_v28, %v46_v21  ;;  %v79_v33 = vrot.slane %v59_v29, %v46_v21 }
  0x14   :  { %v84_v34 = vcombine.low %v67_v30, %v71_v31 }
  0x15   :  { %v85_v35 = vcombine.low %v75_v32, %v79_v33 }
  0x16   :  { %88 = vst [vmem:[%s121_s1] sm:$0x77] %v84_v34 }
  0x17   :  { %89 = vst [vmem:[%s121_s1 + $0x8] sm:$0x77] %v85_v35 }

</bundles_post_ra>
